<compile_context>
chip_gen: v6e
topology: v6e:2x2x1
jax: 0.10.0
libtpu: 0.0.40
codegen_flags: <defaults>
</compile_context>

<pallas_src>
import jax
import jax.numpy as jnp
from jax.experimental import pallas as pl
from jax.experimental.pallas import tpu as pltpu


def _round_up(v, m):
    return ((v + m - 1) // m) * m


def _cdiv(a, b):
    return -(-a // b)


def bilinear_attn_kernel(x_ref, y_ref, wt_ref, b_ref, o_ref):
    # x_ref, y_ref: (Bt, r, Hp)   wt_ref: (Hp, Hp) = W^T   b_ref: (1, Hp) f32
    # o_ref: (Bt, r, r)
    bt, r, hp = y_ref.shape

    # Batch-invariant linear as one flattened MXU matmul: (Bt*r, Hp) @ (Hp, Hp).
    y2 = y_ref[...].reshape(bt * r, hp)
    my = jnp.dot(y2, wt_ref[...], preferred_element_type=jnp.float32)
    my = my + b_ref[...]                      # single f32 bias add per step
    my = my.reshape(bt, r, hp).astype(x_ref.dtype)

    # S[b] = x[b] @ My[b]^T — contract the last (lane-dense) dims directly,
    # no transposed (Hp, r) intermediate.
    s = jnp.einsum("brh,bsh->brs", x_ref[...], my,
                   preferred_element_type=jnp.float32)
    o_ref[...] = s.astype(o_ref.dtype)


def _choose_block_b(B, r, Hp, itemsize):
    """Batches per grid step: feed the MXU while keeping >=2 grid steps."""
    bt = min(B, max(1, _cdiv(256, r)))            # aim for ~256 rows per step
    # Keep the double-buffered x+y blocks comfortably inside VMEM (~8 MiB).
    max_bt = max(1, (8 * 1024 * 1024) // (2 * 2 * r * Hp * itemsize))
    bt = max(1, min(bt, max_bt))
    if B > 1 and _cdiv(B, bt) < 2:                # >=2 steps -> both v7x TCs
        bt = _cdiv(B, 2)
    return bt


def bilinear_attn(x, y, w, b, *, compute_dtype=None, block_b=None):
    """x, y: [B, r, 2H]; w: [2H, 2H] (nn.Linear weight, out x in); b: [2H].

    Returns S: [B, r, r] with S[bi] = x[bi] @ (y[bi] @ w.T + b).T
    """
    B, r, H2 = x.shape
    assert y.shape == (B, r, H2)
    assert w.shape == (H2, H2)
    assert b.shape == (H2,)

    out_dtype = x.dtype

    # Pre-transpose W once (grid-invariant): My = y @ wt + b.
    wt = jnp.transpose(w)

    # Zero-pad the feature dim to a multiple of 128 lanes.
    Hp = max(128, _round_up(H2, 128))
    if Hp != H2:
        pad = Hp - H2
        x = jnp.pad(x, ((0, 0), (0, 0), (0, pad)))
        y = jnp.pad(y, ((0, 0), (0, 0), (0, pad)))
        wt = jnp.pad(wt, ((0, pad), (0, pad)))
        b = jnp.pad(b, ((0, pad),))

    # Optional bf16 operands (f32 accumulation in-kernel) for MXU peak.
    if compute_dtype is not None:
        x = x.astype(compute_dtype)
        y = y.astype(compute_dtype)
        wt = wt.astype(compute_dtype)
    b2d = b.astype(jnp.float32).reshape(1, Hp)

    itemsize = jnp.dtype(x.dtype).itemsize
    Bt = block_b if block_b is not None else _choose_block_b(B, r, Hp, itemsize)

    # Pad batch so Bt divides it (padded rows are zeros; sliced off below).
    Bp = _round_up(B, Bt)
    if Bp != B:
        x = jnp.pad(x, ((0, Bp - B), (0, 0), (0, 0)))
        y = jnp.pad(y, ((0, Bp - B), (0, 0), (0, 0)))

    grid = (Bp // Bt,)

    # Explicit VMEM budget (matters on v7x's 64 MiB): double-buffered x, y,
    # out blocks + W^T + bias, with headroom.
    est = (2 * 2 * Bt * r * Hp * itemsize            # x, y blocks (2x buffered)
           + 2 * Hp * Hp * itemsize                  # W^T
           + 2 * Hp * 4                              # bias
           + 2 * Bt * r * r * jnp.dtype(out_dtype).itemsize)
    vmem_limit = int(min(max(int(est * 1.5), 32 * 1024 * 1024),
                         64 * 1024 * 1024))

    grid_spec = pltpu.PrefetchScalarGridSpec(
        num_scalar_prefetch=0,
        grid=grid,
        in_specs=[
            pl.BlockSpec((Bt, r, Hp), lambda bi: (bi, 0, 0)),   # x block
            pl.BlockSpec((Bt, r, Hp), lambda bi: (bi, 0, 0)),   # y block
            pl.BlockSpec((Hp, Hp), lambda bi: (0, 0)),          # W^T (shared)
            pl.BlockSpec((1, Hp), lambda bi: (0, 0)),           # bias (shared)
        ],
        out_specs=pl.BlockSpec((Bt, r, r), lambda bi: (bi, 0, 0)),
    )

    out = pl.pallas_call(
        bilinear_attn_kernel,
        out_shape=jax.ShapeDtypeStruct((Bp, r, r), out_dtype),
        grid_spec=grid_spec,
        compiler_params=pltpu.CompilerParams(
            dimension_semantics=("parallel",),
            vmem_limit_bytes=vmem_limit,
        ),
    )(x, y, wt, b2d)

    if Bp != B:
        out = out[:B]
    return out


if __name__ == "__main__":
    B, r, hidden = 2, 8, 16
    H2 = 2 * hidden

    key = jax.random.PRNGKey(0)
    kx, ky, kw, kb = jax.random.split(key, 4)

    x = jax.random.normal(kx, (B, r, H2), dtype=jnp.float32)
    y = jax.random.normal(ky, (B, r, H2), dtype=jnp.float32)

    # Deterministic nn.Linear(2H, 2H)-style init: U(-1/sqrt(fan_in), 1/sqrt(fan_in))
    bound = 1.0 / (H2 ** 0.5)
    w = jax.random.uniform(kw, (H2, H2), minval=-bound, maxval=bound,
                           dtype=jnp.float32)
    b = jax.random.uniform(kb, (H2,), minval=-bound, maxval=bound,
                           dtype=jnp.float32)

    # Pure-JAX reference (matches nn.Linear + bmm semantics of the module).
    my_ref = jnp.einsum("brh,oh->bro", y, w) + b
    ref = jnp.einsum("brh,bsh->brs", x, my_ref)

    # f32 path: exact semantics.
    out = jax.block_until_ready(bilinear_attn(x, y, w, b))
    assert out.shape == (B, r, r)
    assert jnp.allclose(out, ref, atol=1e-4, rtol=1e-4)

    # bf16-operand path (MXU-native on v5e/v6e/v7x), f32 accumulation.
    out_bf16 = jax.block_until_ready(
        bilinear_attn(x, y, w, b, compute_dtype=jnp.bfloat16))
    assert out_bf16.shape == (B, r, r)
    assert jnp.allclose(out_bf16, ref, atol=5e-2, rtol=5e-2)

    print("KERNEL_OK")
</pallas_src>

<mosaic_0001>
module attributes {stable_mosaic.version = 11 : i64} {
  func.func @bilinear_attn_kernel(%arg0: i32, %arg1: memref<1x8x128xf32, #tpu.memory_space<vmem>>, %arg2: memref<1x8x128xf32, #tpu.memory_space<vmem>>, %arg3: memref<128x128xf32, #tpu.memory_space<vmem>>, %arg4: memref<1x128xf32, #tpu.memory_space<vmem>>, %arg5: memref<1x8x8xf32, #tpu.memory_space<vmem>>) attributes {dimension_semantics = [#tpu.dimension_semantics<parallel>], iteration_bounds = array<i64: 2>, scalar_prefetch = 0 : i64, scratch_operands = 0 : i64, tpu.core_type = #tpu.core_type<tc>, window_params = [{transform_indices = @transform_0, window_bounds = array<i64: 1, 8, 128>}, {transform_indices = @transform_1, window_bounds = array<i64: 1, 8, 128>}, {pipeline_mode = #tpu.pipeline_mode<synchronous>, transform_indices = @transform_2, window_bounds = array<i64: 128, 128>}, {pipeline_mode = #tpu.pipeline_mode<synchronous>, transform_indices = @transform_3, window_bounds = array<i64: 1, 128>}, {transform_indices = @transform_4, window_bounds = array<i64: 1, 8, 8>}]} {
    %c0 = arith.constant 0 : index
    %c0_0 = arith.constant 0 : index
    %c0_1 = arith.constant 0 : index
    %0 = vector.load %arg2[%c0, %c0_0, %c0_1] : memref<1x8x128xf32, #tpu.memory_space<vmem>>, vector<1x8x128xf32>
    %1 = vector.shape_cast %0 : vector<1x8x128xf32> to vector<8x128xf32>
    %c0_2 = arith.constant 0 : index
    %c0_3 = arith.constant 0 : index
    %2 = vector.load %arg3[%c0_2, %c0_3] : memref<128x128xf32, #tpu.memory_space<vmem>>, vector<128x128xf32>
    %cst = arith.constant dense<0.000000e+00> : vector<8x128xf32>
    %3 = tpu.matmul %1, %2, %cst {dimension_numbers = #tpu.dot_dimension_numbers<[1], [0], [0], [1], [0, 0, 1, 1], [], []>} : vector<8x128xf32>, vector<128x128xf32>, vector<8x128xf32> -> vector<8x128xf32>
    %c0_4 = arith.constant 0 : index
    %c0_5 = arith.constant 0 : index
    %4 = vector.load %arg4[%c0_4, %c0_5] : memref<1x128xf32, #tpu.memory_space<vmem>>, vector<1x128xf32>
    %5 = vector.broadcast %4 : vector<1x128xf32> to vector<8x128xf32>
    %6 = arith.addf %3, %5 : vector<8x128xf32>
    %7 = vector.shape_cast %6 : vector<8x128xf32> to vector<1x8x128xf32>
    %c0_6 = arith.constant 0 : index
    %c0_7 = arith.constant 0 : index
    %c0_8 = arith.constant 0 : index
    %8 = vector.load %arg1[%c0_6, %c0_7, %c0_8] : memref<1x8x128xf32, #tpu.memory_space<vmem>>, vector<1x8x128xf32>
    "tpu.trace_start"() <{level = 10 : i32, message = "brh,bsh->brs"}> : () -> ()
    %cst_9 = arith.constant dense<0.000000e+00> : vector<1x8x8xf32>
    %9 = tpu.matmul %8, %7, %cst_9 {dimension_numbers = #tpu.dot_dimension_numbers<[2], [2], [1], [1], [0, 0, 0, 1, 1, 1], [0], [0]>} : vector<1x8x128xf32>, vector<1x8x128xf32>, vector<1x8x8xf32> -> vector<1x8x8xf32>
    "tpu.trace_stop"() : () -> ()
    %c0_10 = arith.constant 0 : index
    %c0_11 = arith.constant 0 : index
    %c0_12 = arith.constant 0 : index
    %10 = vector.load %arg5[%c0_10, %c0_11, %c0_12] : memref<1x8x8xf32, #tpu.memory_space<vmem>>, vector<1x8x8xf32>
    tpu.vector_store %arg5[%c0_10, %c0_11, %c0_12], %9 {strides = array<i32>} : memref<1x8x8xf32, #tpu.memory_space<vmem>>, vector<1x8x8xf32>,
    return
  }
  func.func @transform_0(%arg0: i32) -> (i32, i32, i32) {
    %c0_i32 = arith.constant 0 : i32
    %c0_i32_0 = arith.constant 0 : i32
    %c0_i32_1 = arith.constant 0 : i32
    return %arg0, %c0_i32, %c0_i32_0 : i32, i32, i32
  }
  func.func @transform_1(%arg0: i32) -> (i32, i32, i32) {
    %c0_i32 = arith.constant 0 : i32
    %c0_i32_0 = arith.constant 0 : i32
    %c0_i32_1 = arith.constant 0 : i32
    return %arg0, %c0_i32, %c0_i32_0 : i32, i32, i32
  }
  func.func @transform_2(%arg0: i32) -> (i32, i32) {
    %c0_i32 = arith.constant 0 : i32
    %c0_i32_0 = arith.constant 0 : i32
    %c0_i32_1 = arith.constant 0 : i32
    return %c0_i32, %c0_i32_0 : i32, i32
  }
  func.func @transform_3(%arg0: i32) -> (i32, i32) {
    %c0_i32 = arith.constant 0 : i32
    %c0_i32_0 = arith.constant 0 : i32
    %c0_i32_1 = arith.constant 0 : i32
    return %c0_i32, %c0_i32_0 : i32, i32
  }
  func.func @transform_4(%arg0: i32) -> (i32, i32, i32) {
    %c0_i32 = arith.constant 0 : i32
    %c0_i32_0 = arith.constant 0 : i32
    %c0_i32_1 = arith.constant 0 : i32
    return %arg0, %c0_i32, %c0_i32_0 : i32, i32, i32
  }
}

</mosaic_0001>

<bundles_post_ra>
// kernel: tpu_custom_call.1
= control target key start
LH: loop header
LB: loop body
LE: loop exit
PB: predicated region body
PF: predicated region fallthrough
CT: control target
= control target key end

     0   :  { %s1096_s0 = inlined_call_operand.hbm [shape: f32[2,8,128], index: 0, kind: input, shape index: {}]   ;;  %s1097_s1 = inlined_call_operand.hbm [shape: f32[2,8,128], index: 1, kind: input, shape index: {}]   ;;  %s1098_s2 = inlined_call_operand.hbm [shape: f32[128,128], index: 2, kind: input, shape index: {}]   ;;  %s1099_s3 = inlined_call_operand.vmem [shape: f32[1,128], index: 3, kind: input, shape index: {}]   ;;  %s1100_s4 = inlined_call_operand.hbm [shape: f32[2,8,8], index: 4, kind: output, shape index: {}]  }
   0x1   :  { %1105 = sst [smem:[#allocation13_spill]] %s1098_s2 }
   0x2   :  { %9 = vsyncpa [#allocation3], 0 }
   0x3   :  { %11 = vsyncpa [#allocation3 + $0x1], 0 }
   0x4   :  { %12 = vsyncpa [#allocation6], 0 }
   0x5   :  { %14 = vsyncpa [#allocation6 + $0x1], 0 }
   0x6   :  { %15 = vsyncpa [#allocation4], 0 }
   0x7   :  { %17 = vsyncpa [#allocation4 + $0x1], 0  ;;  %s879_s15 = smov 0   ;;  %s881_s16 = smov 0  }
   0x8   :  { %s883_s17 = smov 0   ;;  %s885_s18 = smov 0  }
   0x9 LB: > { %s900_s19 = sadd.s32 4294967295, %s844_s18   ;;  %s547_s20 = sadd.s32 4294967294, %s844_s18   ;;  %s844_s18 = sphi %s885_s18, %s1124_s18   ;;  %s840_s17 = sphi %s883_s17, %s1123_s17   ;;  %s836_s16 = sphi %s881_s16, %s1122_s16   ;;  %s832_s15 = sphi %s879_s15, %s1121_s15  }
   0xa   : > { %p43_p0 = scmp.ne.s32.totalorder %s836_s16, %s832_s15  ;;  %p1101_p1 = scmp.eq.s32.totalorder %s900_s19, 0 }
   0xb   : > { %p141_p3 = scmp.eq.s32.totalorder %s547_s20, 1  ;;  %p548_p5 = scmp.ge.s32.totalorder %s844_s18, 1 }
   0xc   : > { %p909_p4 = por %p1101_p1, %p43_p0  ;;  %p148_p7 = scmp.lt.s32.totalorder %s844_s18, 3 }
   0xd   : > { %p914_p6 = por %p141_p3, %p43_p0  ;;  %s846_s24 = smov [#allocation7]  }
   0xe   : > { %s1106_s21 = scalar_select %p909_p4, 1, 0 }
   0xf   : > { %s1107_s22 = scalar_select %p914_p6, 1, 0 }
  0x10   : > { %p919_p8 = pnand %p548_p5, %p148_p7  ;;  %s160_s25 = sshll.u32 %s846_s24, 4  ;;  %s161_s25 = int_to_ptr.vmem [resolvable:$true] %s160_s25 }
  0x11   : > { %s933_s27 = sadd.s32 1, %s844_s18   ;;  %s30_s28 = sadd.s32 1, %s840_s17 }
  0x12   : > { %s1108_s23 = scalar_select %p919_p8, 1, 0 }
  0x13   : > { %p634_p9 = pneg %p919_p8  ;;  %s27_s29 = ssub.s32 %s844_s18, %s933_s27 }
  0x14   : > { %s701_s30 = scalar_lea.vmem %s161_s25, 2048  ;;  %p709_p5 = scmp.lt.s32.totalorder %s161_s25, %s161_s25 }
  0x15   : > { %p928_p11 = pnand %p634_p9, %p1101_p1  ;;  %p702_p13 = scmp.ne.s32.totalorder %s161_s25, %s701_s30 }
  0x16   : > { %p710_p7 = scmp.lt.s32.totalorder %s701_s30, %s701_s30 }
  0x17   : > { %p692_p12 = pneg %p928_p11 }
  0x18   : > { %p711_p10 = por %p710_p7, %p709_p5 }
  0x19   : > { %p704_p0 = pnand %p702_p13, %p692_p12 }
  0x1b   : > { %p705_p3 = pneg %p704_p0 }
  0x1d   : > { %p712_p2 = pnand %p711_p10, %p705_p3 }
  0x1f   : > { %715 = shalt.err (!%p712_p2)
}
  0x20   : > { %s847_s5 = smov 128   ;;  %s848_s6 = smov 8  }
  0x21   : > { %s1110_s2 = sld [smem:[#allocation13_spill]]  ;;  %p28_p9 = scmp.eq.s32.totalorder %s27_s29, 0 }
  0x22   : > { %p37_p12 = scmp.ne.s32.totalorder %s840_s17, %s836_s16  ;;  %p38_p10 = scmp.eq.s32.totalorder %s844_s18, 0 }
  0x23   : > { %p650_p2 = scmp.lt.s32.totalorder %s844_s18, 2  ;;  %p1111_p0 = scmp.eq.s32.totalorder %s900_s19, 1 }
  0x24   : > { %s950_s9 = scalar_select %p28_p9, %s840_s17, %s30_s28  }
  0x25   : > { %p39_p13 = por %p38_p10, %p37_p12  ;;  %p954_p3 = por %p1111_p0, %p37_p12 }
  0x26   : > { %s177_s11 = sand.u32 1, %s840_s17   ;;  %s552_s12 = sshll.u32 %s844_s18, 7 }
  0x27   : > { %637 = dma.hbm_to_vmem [thread:$0]  (!%p928_p11), %s1110_s2, 2048, %s161_s25, [#allocation6], %s847_s5, %s847_s5, %s848_s6  }
  0x28   : > { %s1112_s10 = scalar_select %p954_p3, 1, 0 }
  0x29   : > { %s960_s13 = sshll.u32 %s177_s11, 3  ;;  %s965_s24 = scalar_lea.hbm %s1096_s0, %s552_s12 }
  0x2a   : > { %s181_s25 = scalar_lea.vmem [#allocation2], %s960_s13  ;;  %p968_p11 = pnand %p650_p2, %p39_p13 }
  0x2b   : > { %s188_s26 = sshll.u32 %s181_s25, 4  ;;  %s975_s5 = scalar_lea.hbm %s1097_s1, %s552_s12  ;;  %s189_s26 = int_to_ptr.vmem [resolvable:$true] %s188_s26 }
  0x2c   : > { %s178_s6 = scalar_lea.sflag [#allocation3], %s177_s11  ;;  %s716_s7 = scalar_lea.hbm %s965_s24, 128 }
  0x2d   : > { %p717_p5 = scmp.ne.s32.totalorder %s965_s24, %s716_s7  ;;  %p718_p7 = pneg %p968_p11 }
  0x2e   : > { %s721_s20 = scalar_lea.hbm %s1096_s0, 256  ;;  %p722_p10 = scmp.lt.s32.totalorder %s965_s24, %s1096_s0 }
  0x2f   : > { %p719_p9 = pnand %p718_p7, %p717_p5  ;;  %p723_p2 = scmp.lt.s32.totalorder %s721_s20, %s716_s7 }
  0x31   : > { %p720_p12 = pneg %p719_p9  ;;  %p724_p13 = por %p723_p2, %p722_p10 }
  0x33   : > { %p725_p0 = pnand %p724_p13, %p720_p12 }
  0x35   : > { %728 = shalt.err (!%p725_p0)
}
  0x36   : > { %s729_s11 = scalar_lea.vmem %s189_s26, 128  ;;  %s849_s12 = smov [#allocation2]  }
  0x37   : > { %p730_p1 = scmp.ne.s32.totalorder %s189_s26, %s729_s11  ;;  %s734_s29 = sshll.u32 %s849_s12, 4  ;;  %s735_s29 = int_to_ptr.vmem [resolvable:$false] %s734_s29 }
  0x38   : > { %s736_s30 = scalar_lea.vmem %s735_s29, 256  ;;  %p737_p9 = scmp.lt.s32.totalorder %s189_s26, %s735_s29 }
  0x39   : > { %p732_p6 = pnand %p730_p1, %p718_p7  ;;  %p738_p3 = scmp.lt.s32.totalorder %s736_s30, %s729_s11 }
  0x3b   : > { %p733_p5 = pneg %p732_p6  ;;  %p739_p4 = por %p738_p3, %p737_p9 }
  0x3d   : > { %p740_p8 = pnand %p739_p4, %p733_p5 }
  0x3f   : > { %743 = shalt.err (!%p740_p8)
}
  0x40   : > { %641 = dma.hbm_to_vmem [thread:$0]  (!%p968_p11), %s965_s24, 128, %s189_s26, %s178_s6  }
  0x41   : > { %s195_s2 = sand.u32 1, %s844_s18   ;;  %s199_s7 = scalar_lea.vmem [#allocation5], %s960_s13 }
  0x42   : > { %s206_s8 = sshll.u32 %s199_s7, 4  ;;  %s196_s14 = scalar_lea.sflag [#allocation6], %s195_s2  ;;  %s207_s8 = int_to_ptr.vmem [resolvable:$true] %s206_s8 }
  0x43   : > { %s744_s20 = scalar_lea.hbm %s975_s5, 128  ;;  %s749_s12 = scalar_lea.hbm %s1097_s1, 256 }
  0x44   : > { %p745_p1 = scmp.ne.s32.totalorder %s975_s5, %s744_s20  ;;  %p750_p8 = scmp.lt.s32.totalorder %s975_s5, %s1097_s1 }
  0x45   : > { %p751_p3 = scmp.lt.s32.totalorder %s749_s12, %s744_s20 }
  0x46   : > { %p747_p4 = pnand %p745_p1, %p718_p7 }
  0x47   : > { %p752_p12 = por %p751_p3, %p750_p8 }
  0x48   : > { %p748_p6 = pneg %p747_p4 }
  0x4a   : > { %p753_p10 = pnand %p752_p12, %p748_p6 }
  0x4c   : > { %756 = shalt.err (!%p753_p10)
}
  0x4d   : > { %s757_s13 = scalar_lea.vmem %s207_s8, 128  ;;  %s850_s24 = smov [#allocation5]  }
  0x4e   : > { %p758_p2 = scmp.ne.s32.totalorder %s207_s8, %s757_s13  ;;  %s762_s26 = sshll.u32 %s850_s24, 4  ;;  %s763_s26 = int_to_ptr.vmem [resolvable:$false] %s762_s26 }
  0x4f   : > { %s764_s6 = scalar_lea.vmem %s763_s26, 256  ;;  %p765_p5 = scmp.lt.s32.totalorder %s207_s8, %s763_s26 }
  0x50   : > { %p760_p13 = pnand %p758_p2, %p718_p7  ;;  %p766_p9 = scmp.lt.s32.totalorder %s764_s6, %s757_s13 }
  0x52   : > { %p761_p0 = pneg %p760_p13  ;;  %p767_p1 = por %p766_p9, %p765_p5 }
  0x54   : > { %p768_p4 = pnand %p767_p1, %p761_p0 }
  0x56   : > { %771 = shalt.err (!%p768_p4)
}
  0x57   : > { %644 = dma.hbm_to_vmem [thread:$0]  (!%p968_p11), %s975_s5, 128, %s207_s8, %s196_s14  }
  0x58   : > { %p1114_p6 = scmp.ne.s32.totalorder %s1108_s23, 0 }
  0x59   : > { %s1020_s2 = sand.u32 (!%p1114_p6), 1, %s836_s16   ;;  %p1115_p7 = scmp.ne.s32.totalorder (!%p1114_p6), %s1106_s21, 0 }
  0x5a   : > { %215 = sbr.rel (%p1114_p6) target bundleno = 541 (0x21d), region = 36  ;;  %s1023_s7 = sshll.u32 (!%p1114_p6), %s1020_s2, 3 }
  0x5b   : > { %s218_s20 = scalar_lea.sflag (!%p1114_p6), [#allocation3], %s1020_s2  ;;  %s221_s25 = scalar_lea.vmem (!%p1114_p6), [#allocation2], %s1023_s7 }
  0x5f   : > { %815 = dma.done.wait (%p1115_p7), %s218_s20, 128  }
  0x60   : > { %817 = vsyncadd (%p1115_p7), %s218_s20, 4294967168  ;;  %s226_s23 = sand.u32 1, %s900_s19   ;;  %s230_s5 = scalar_lea.vmem [#allocation5], %s1023_s7 }
  0x61   : > { %s227_s28 = scalar_lea.sflag [#allocation6], %s226_s23 }
  0x62   : > { %819 = dma.done.wait (%p1115_p7), %s227_s28, 128  }
  0x63   : > { %821 = vsyncadd (%p1115_p7), %s227_s28, 4294967168  ;;  %p1116_p11 = scmp.eq.s32.totalorder %s900_s19, 0 }
  0x65   : > { %823 = dma.done.wait (%p1116_p11), [#allocation6], 2048   ;;  %p1117_p8 = pmov %p1116_p11 }
  0x66   : > { %v851_v0 = vmov 0.0   ;;  %vm852_vm0 = vmmov 0   ;;  %v280_v1 = vld [vmem:[#allocation7 + $0x78] sm:$0xff]  ;;  %v279_v2 = vld [vmem:[#allocation7 + $0x70] sm:$0xff]  ;;  %v278_v3 = vld [vmem:[#allocation7 + $0x68] sm:$0xff]  ;;  %s562_s14 = sshll.u32 %s900_s19, 7 }
  0x67   : > { %825 = vsyncadd (%p1117_p8), [#allocation6], 4294965248  ;;  %584 = vmatprep.subr.mxu0 %v851_v0  ;;  %616 = vmatprep.mubr.msk.f32.mxu0 %vm852_vm0, %v851_v0  ;;  %v277_v4 = vld [vmem:[#allocation7 + $0x60] sm:$0xff]  ;;  %v276_v5 = vld [vmem:[#allocation7 + $0x58] sm:$0xff]  ;;  %s263_s11 = scalar_lea.vmem [#allocation8], %s1023_s7  ;;  %vm429_vm1 = vcmask 64512   ;;  %s1053_s13 = scalar_lea.hbm %s1100_s4, %s562_s14 }
  0x68   : > { %619 = vmatprep.subr.mxu1 %v851_v0  ;;  %621 = vmatprep.mubr.msk.f32.mxu1 %vm852_vm0, %v851_v0  ;;  %v275_v6 = vld [vmem:[#allocation7 + $0x50] sm:$0xff]  ;;  %v274_v7 = vld [vmem:[#allocation7 + $0x48] sm:$0xff]  ;;  %v273_v8 = vld [vmem:[#allocation7 + $0x40] sm:$0xff]  ;;  %s445_s12 = sshll.u32 %s263_s11, 4  ;;  %s432_s24 = scalar_lea.sflag [#allocation4], %s1020_s2  ;;  %s1055_s12 = int_to_ptr.vmem [resolvable:$true] %s445_s12 }
  0x69   : > { %585 = vmatpush3.msra.mxu0 %v280_v1  ;;  %v272_v9 = vld [vmem:[#allocation7 + $0x38] sm:$0xff]  ;;  %v271_v10 = vld [vmem:[#allocation7 + $0x30] sm:$0xff]  ;;  %v270_v11 = vld [vmem:[#allocation7 + $0x28] sm:$0xff]  ;;  %s772_s26 = scalar_lea.vmem %s1055_s12, 128  ;;  %p1118_p12 = scmp.ne.s32.totalorder %s1112_s10, 0 }
  0x6a   : > { %586 = vmatprep.subr.mxu0 %v851_v0  ;;  %v269_v12 = vld [vmem:[#allocation7 + $0x20] sm:$0xff]  ;;  %v268_v13 = vld [vmem:[#allocation7 + $0x18] sm:$0xff]  ;;  %v267_v14 = vld [vmem:[#allocation7 + $0x10] sm:$0xff]  ;;  %p773_p3 = scmp.ne.s32.totalorder %s1055_s12, %s772_s26  ;;  %s853_s19 = smov [#allocation8]  }
  0x6b   : > { %587 = vmatpush3.msra.mxu0 %v279_v2  ;;  %v266_v15 = vld [vmem:[#allocation7 + $0x8] sm:$0xff]  ;;  %v265_v16 = vld [vmem:[#allocation7] sm:$0xff]  ;;  %v264_v17 = vld [vmem:[%s230_s5] sm:$0xff]  ;;  %s776_s6 = sshll.u32 %s853_s19, 4  ;;  %s777_s6 = int_to_ptr.vmem [resolvable:$false] %s776_s6 }
  0x6c   : > { %588 = vmatprep.subr.mxu0 %v851_v0  ;;  %v560_v18 = vld [vmem:[%s1099_s3] ss:$0 sm:$0xff]  ;;  %p774_p10 = pnand %p773_p3, %p1118_p12  ;;  %s778_s7 = scalar_lea.vmem %s777_s6, 256 }
  0x6d   : > { %589 = vmatpush3.msra.mxu0 %v278_v3  ;;  %v358_v22 = vld [vmem:[%s221_s25] sm:$0xff]  ;;  %p779_p13 = scmp.lt.s32.totalorder %s1055_s12, %s777_s6  ;;  %p780_p0 = scmp.lt.s32.totalorder %s778_s7, %s772_s26 }
  0x6e   : > { %590 = vmatprep.subr.mxu0 %v851_v0  ;;  %p775_p2 = pneg %p774_p10 }
  0x6f   : > { %591 = vmatpush3.msra.mxu0 %v277_v4  ;;  %p781_p5 = por %p780_p0, %p779_p13 }
  0x70   : > { %592 = vmatprep.subr.mxu0 %v851_v0 }
  0x71   : > { %593 = vmatpush3.msra.mxu0 %v276_v5  ;;  %p782_p9 = pnand %p781_p5, %p775_p2 }
  0x72   : > { %594 = vmatprep.subr.mxu0 %v851_v0 }
  0x73   : > { %595 = vmatpush3.msra.mxu0 %v275_v6 }
  0x74   : > { %596 = vmatprep.subr.mxu0 %v851_v0 }
  0x75   : > { %597 = vmatpush3.msra.mxu0 %v274_v7 }
  0x76   : > { %598 = vmatprep.subr.mxu0 %v851_v0 }
  0x77   : > { %599 = vmatpush3.msra.mxu0 %v273_v8 }
  0x78   : > { %600 = vmatprep.subr.mxu0 %v851_v0 }
  0x79   : > { %601 = vmatpush3.msra.mxu0 %v272_v9 }
  0x7a   : > { %602 = vmatprep.subr.mxu0 %v851_v0 }
  0x7b   : > { %603 = vmatpush3.msra.mxu0 %v271_v10 }
  0x7c   : > { %604 = vmatprep.subr.mxu0 %v851_v0 }
  0x7d   : > { %605 = vmatpush3.msra.mxu0 %v270_v11 }
  0x7e   : > { %606 = vmatprep.subr.mxu0 %v851_v0 }
  0x7f   : > { %607 = vmatpush3.msra.mxu0 %v269_v12 }
  0x80   : > { %608 = vmatprep.subr.mxu0 %v851_v0 }
  0x81   : > { %609 = vmatpush3.msra.mxu0 %v268_v13 }
  0x82   : > { %610 = vmatprep.subr.mxu0 %v851_v0 }
  0x83   : > { %611 = vmatpush3.msra.mxu0 %v267_v14 }
  0x84   : > { %612 = vmatprep.subr.mxu0 %v851_v0 }
  0x85   : > { %613 = vmatpush3.msra.mxu0 %v266_v15 }
  0x86   : > { %614 = vmatprep.subr.mxu0 %v851_v0 }
  0x87   : > { %615 = vmatpush3.msra.mxu0 %v265_v16 }
  0x88   : > { %617 = vmatmul.mubr.f32.vlgmr.msra.gmra.mxu0 %v264_v17 }
 0x148   : > { %v354_v19 = vpop.f32.mrf.mxu0 }
 0x149   : > { %v355_v20 = vadd.f32 %v560_v18, %v354_v19 }
 0x14a   : > { %v618_v21 = vpop.f32.mrf.mxu0 }
 0x14b   : > { %620 = vmatpush3.xpose.msra.mxu1 %v355_v20 }
 0x14e   : > { %622 = vmatmul.mubr.f32.vlgmr.msra.gmra.mxu1 %v358_v22 }
 0x20e   : > { %v425_v23 = vpop.f32.mrf.mxu1 }
 0x20f   : > { %430 = vst.msk [vmem:[%s263_s11] sm:$0xff] %vm429_vm1, %v425_v23 }
 0x210   : > { %v623_v24 = vpop.f32.mrf.mxu1 }
 0x211   : > { %785 = shalt.err (!%p782_p9)
}
 0x212   : > { %s786_s20 = scalar_lea.hbm %s1053_s13, 128  ;;  %s790_s23 = scalar_lea.hbm %s1100_s4, 256 }
 0x213   : > { %p787_p1 = scmp.ne.s32.totalorder %s1053_s13, %s786_s20  ;;  %p791_p7 = scmp.lt.s32.totalorder %s1053_s13, %s1100_s4 }
 0x214   : > { %p792_p11 = scmp.lt.s32.totalorder %s790_s23, %s786_s20 }
 0x215   : > { %p788_p4 = pnand %p787_p1, %p1118_p12 }
 0x216   : > { %p793_p8 = por %p792_p11, %p791_p7 }
 0x217   : > { %p789_p6 = pneg %p788_p4 }
 0x219   : > { %p794_p3 = pnand %p793_p8, %p789_p6 }
 0x21b   : > { %797 = shalt.err (!%p794_p3)
}
 0x21c   : > { %632 = dma.vmem_to_hbm [thread:$0]  (%p1118_p12), %s1055_s12, 128, %s1053_s13, %s432_s24  }
 0x21d PF: > { %s457_s21 = sand.u32 1, %s832_s15   ;;  %p1119_p10 = scmp.ne.s32.totalorder %s1107_s22, 0 }
 0x21e   : > { %p1120_p2 = scmp.ge.s32.totalorder %s844_s18, 2  ;;  %s458_s8 = scalar_lea.sflag [#allocation4], %s457_s21 }
 0x220   : > { %p646_p13 = pnand %p1120_p2, %p1119_p10 }
 0x222   : > { %p647_p0 = pneg %p646_p13 }
 0x224   : > { %827 = dma.done.wait (%p647_p0), %s458_s8, 128  }
 0x225   : > { %829 = vsyncadd (%p647_p0), %s458_s8, 4294967168  ;;  %p20_p5 = scmp.ge.s32.totalorder %s933_s27, 4   ;;  %s1121_s15 = smov %s836_s16 }
 0x226   : > { %s1122_s16 = smov %s840_s17  ;;  %s1123_s17 = smov %s950_s9 }
 0x227   : > { %s1124_s18 = smov %s933_s27  ;;  %22 = sbr.rel (!%p20_p5) target bundleno = 9 (0x9), region = 98 }
 0x22c   :  { %463 = vsyncpa [#allocation3], 1 }
 0x22d   :  { %465 = vsyncpa [#allocation3 + $0x1], 1 }
 0x22e   :  { %466 = vsyncpa [#allocation6], 1 }
 0x22f   :  { %468 = vsyncpa [#allocation6 + $0x1], 1 }
 0x230   :  { %469 = vsyncpa [#allocation4], 1 }
 0x231   :  { %471 = vsyncpa [#allocation4 + $0x1], 1 }

</bundles_post_ra>
